<compile_context>
chip_gen: v7x
topology: tpu7x:2x2x1
jax: 0.10.0
libtpu: 0.0.40
codegen_flags: <defaults>
</compile_context>

<pallas_src>
import jax
import jax.numpy as jnp
from jax.experimental import pallas as pl
from jax.experimental.pallas import tpu as pltpu


# ----------------------------------------------------------------------------
# Hardware-aware sizing helpers
# ----------------------------------------------------------------------------
def _physical_vmem_bytes():
    try:
        cap = getattr(pltpu.get_tpu_info(), "vmem_capacity_bytes", None)
        if cap:
            return int(cap)
    except Exception:
        pass
    return 64 * 1024 * 1024          # v7x per-TC size; safe lower bound everywhere


def _default_vmem_budget():
    # ~3/8 of physical VMEM for the double-buffered in+out image blocks:
    # ~24 MiB on v7x (64 MiB VMEM), ~48 MiB on v5e/v6e (128 MiB VMEM).
    return max(16 * 1024 * 1024, (3 * _physical_vmem_bytes()) // 8)


def _pick_tile_rows(M, C, budget_bytes):
    # in + out image blocks, each double-buffered: 4 buffers of (rows, C) f32.
    per_row = 4 * C * 4
    rows = budget_bytes // per_row
    if rows >= M:
        return M                     # full dim -> exempt from the 8-row rule
    return max(8, (rows // 8) * 8)


# ----------------------------------------------------------------------------
# Stage 1: Text2ImageGate  ->  gate of shape (B, 1, C)   (single small Pallas call)
# ----------------------------------------------------------------------------
def _gate_kernel(text_re_ref, text_im_ref, sel_re_ref, sel_im_ref,
                 w_ref, b_ref, gate_ref):
    # real part of (text * select_para):  re*re - im*im               (B, s, C)
    prod_re = (text_re_ref[...] * sel_re_ref[...][None]
               - text_im_ref[...] * sel_im_ref[...][None])
    # AvgPool1d(kernel_size=s) over the length-s sequence == mean over s  (B, C)
    pooled = jnp.mean(prod_re, axis=1)
    # Conv1d(d_model, d_model, k=1) == pooled @ w.T + b, with the transpose folded
    # into dot_general dimension_numbers (MXU NT matmul).  Default matmul precision
    # matches the XLA reference; pass Precision.HIGHEST here for exact f32 parity.
    gate = jax.lax.dot_general(
        pooled, w_ref[...],
        dimension_numbers=(((1,), (1,)), ((), ())),
        preferred_element_type=jnp.float32)
    gate_ref[...] = gate + b_ref[...]


def _compute_gate(text_re, text_im, sel_re, sel_im, conv_w, conv_b):
    B, s, C = text_re.shape
    gate = pl.pallas_call(
        _gate_kernel,
        out_shape=jax.ShapeDtypeStruct((B, C), jnp.float32),
    )(text_re, text_im, sel_re, sel_im, conv_w, conv_b.reshape(1, C))
    return gate.reshape(B, 1, C)


# ----------------------------------------------------------------------------
# Stage 2: image * gate  (tiled, all-parallel broadcast multiply)
# ----------------------------------------------------------------------------
def _scale_kernel(gate_ref, img_ref, out_ref):
    # (1, tn, C) * (1, 1, C): gate broadcast over the folded (re/im, pixel) axis.
    out_ref[...] = img_ref[...] * gate_ref[...]


def image_frequency_selection(image, text_re, text_im, sel_re, sel_im,
                              conv_w, conv_b, *, tile_rows=None,
                              vmem_budget_bytes=None):
    """image: (B, 2, N, C) f32 with axis 1 = (real, imag) planes of the complex image.
    text_*: (B, s, C) f32.  sel_*: (s, C) f32 (select_para[..., 0] / [..., 1]).
    conv_w: (C_out, C_in) f32.  conv_b: (C,) f32.
    Returns (B, 2, N, C) f32 = image * gate (re & im scaled by the same real gate)."""
    B, two, N, C = image.shape
    if two != 2:
        raise ValueError("image axis 1 must hold (real, imag) planes")

    # ---- Stage 1: gate (B, 1, C) --------------------------------------------
    gate = _compute_gate(text_re, text_im, sel_re, sel_im, conv_w, conv_b)

    # ---- Stage 2: fold re/im into the pixel axis and tile it -----------------
    M = 2 * N
    img2 = image.reshape(B, M, C)     # contiguous -> free metadata-only reshape

    phys = _physical_vmem_bytes()
    budget = _default_vmem_budget() if vmem_budget_bytes is None else int(vmem_budget_bytes)
    budget = min(budget, phys - (12 << 20))   # never let a caller budget overrun VMEM

    if tile_rows is None:
        tn = _pick_tile_rows(M, C, budget)
    else:
        tn = min(int(tile_rows), M)
        if tn < M:
            tn = max(8, (tn // 8) * 8)

    # VMEM limit derived from the actual block footprint (+ gate + Mosaic headroom).
    block_bytes = tn * C * 4
    needed = 4 * block_bytes + 4 * C * 4 + (2 << 20)
    vmem_limit = max(16 << 20, min(needed, phys - (8 << 20)))

    grid = (B, pl.cdiv(M, tn))
    img_spec = pl.BlockSpec((1, tn, C), lambda b, n: (b, n, 0))
    gate_spec = pl.BlockSpec((1, 1, C), lambda b, n: (b, 0, 0))

    out = pl.pallas_call(
        _scale_kernel,
        out_shape=jax.ShapeDtypeStruct((B, M, C), jnp.float32),
        grid_spec=pltpu.PrefetchScalarGridSpec(
            num_scalar_prefetch=0,
            grid=grid,
            in_specs=[gate_spec, img_spec],
            out_specs=img_spec,
        ),
        compiler_params=pltpu.CompilerParams(
            dimension_semantics=("parallel", "parallel"),
            vmem_limit_bytes=int(vmem_limit)),
    )(gate, img2)

    return out.reshape(B, 2, N, C)


# ----------------------------------------------------------------------------
# Reference + demo
# ----------------------------------------------------------------------------
def _reference(image, text_re, text_im, sel_re, sel_im, conv_w, conv_b):
    prod_re = text_re * sel_re[None] - text_im * sel_im[None]      # (B, s, C)
    pooled = prod_re.mean(axis=1)                                  # (B, C)
    gate = jax.lax.dot_general(pooled, conv_w,
                               (((1,), (1,)), ((), ())),
                               preferred_element_type=jnp.float32) + conv_b
    return image * gate[:, None, None, :]                          # (B, 2, N, C)


def _run_case(key, *, B, s, N, C, tile_rows=None):
    keys = jax.random.split(key, 7)
    image = jax.random.normal(keys[0], (B, 2, N, C), jnp.float32)    # stacked re/im
    text_re = jax.random.normal(keys[1], (B, s, C), jnp.float32)
    text_im = jax.random.normal(keys[2], (B, s, C), jnp.float32)
    sel_re = jax.random.normal(keys[3], (s, C), jnp.float32)         # select_para[..., 0]
    sel_im = jax.random.normal(keys[4], (s, C), jnp.float32)         # select_para[..., 1]
    conv_w = jax.random.normal(keys[5], (C, C), jnp.float32) * 0.05  # Conv1d k=1 weight
    conv_b = jax.random.normal(keys[6], (C,), jnp.float32) * 0.05    # Conv1d bias

    out = image_frequency_selection(image, text_re, text_im, sel_re, sel_im,
                                    conv_w, conv_b, tile_rows=tile_rows)
    jax.block_until_ready(out)

    ref = _reference(image, text_re, text_im, sel_re, sel_im, conv_w, conv_b)
    assert jnp.allclose(out, ref, atol=2e-4, rtol=2e-4), f"mismatch (N={N}, C={C})"


if __name__ == "__main__":
    key = jax.random.PRNGKey(0)
    k1, k2 = jax.random.split(key)
    # Lane-aligned d_model; the whole (re/im-folded) image fits one tile per batch.
    _run_case(k1, B=2, s=8, N=64, C=128)
    # Non-128-aligned d_model (full-C block, no pad/slice) + forced row tiling with a
    # partial edge tile: exercises the masked-store path and the cdiv grid.
    _run_case(k2, B=2, s=8, N=72, C=96, tile_rows=32)
    print("KERNEL_OK")
</pallas_src>

<mosaic_0001>
module attributes {stable_mosaic.version = 11 : i64} {
  func.func @_gate_kernel(%arg0: memref<2x8x128xf32, #tpu.memory_space<vmem>>, %arg1: memref<2x8x128xf32, #tpu.memory_space<vmem>>, %arg2: memref<8x128xf32, #tpu.memory_space<vmem>>, %arg3: memref<8x128xf32, #tpu.memory_space<vmem>>, %arg4: memref<128x128xf32, #tpu.memory_space<vmem>>, %arg5: memref<1x128xf32, #tpu.memory_space<vmem>>, %arg6: memref<2x128xf32, #tpu.memory_space<vmem>>) attributes {dimension_semantics = [], scalar_prefetch = 0 : i64, scratch_operands = 0 : i64, tpu.core_type = #tpu.core_type<tc>} {
    %c0 = arith.constant 0 : index
    %c0_0 = arith.constant 0 : index
    %c0_1 = arith.constant 0 : index
    %0 = vector.load %arg0[%c0, %c0_0, %c0_1] : memref<2x8x128xf32, #tpu.memory_space<vmem>>, vector<2x8x128xf32>
    %c0_2 = arith.constant 0 : index
    %c0_3 = arith.constant 0 : index
    %1 = vector.load %arg2[%c0_2, %c0_3] : memref<8x128xf32, #tpu.memory_space<vmem>>, vector<8x128xf32>
    %2 = vector.shape_cast %1 : vector<8x128xf32> to vector<1x8x128xf32>
    %3 = vector.broadcast %2 : vector<1x8x128xf32> to vector<2x8x128xf32>
    %4 = arith.mulf %0, %3 : vector<2x8x128xf32>
    %c0_4 = arith.constant 0 : index
    %c0_5 = arith.constant 0 : index
    %c0_6 = arith.constant 0 : index
    %5 = vector.load %arg1[%c0_4, %c0_5, %c0_6] : memref<2x8x128xf32, #tpu.memory_space<vmem>>, vector<2x8x128xf32>
    %c0_7 = arith.constant 0 : index
    %c0_8 = arith.constant 0 : index
    %6 = vector.load %arg3[%c0_7, %c0_8] : memref<8x128xf32, #tpu.memory_space<vmem>>, vector<8x128xf32>
    %7 = vector.shape_cast %6 : vector<8x128xf32> to vector<1x8x128xf32>
    %8 = vector.broadcast %7 : vector<1x8x128xf32> to vector<2x8x128xf32>
    %9 = arith.mulf %5, %8 : vector<2x8x128xf32>
    %10 = arith.subf %4, %9 : vector<2x8x128xf32>
    %cst = arith.constant dense<0.000000e+00> : vector<2x128xf32>
    %11 = vector.multi_reduction <add>, %10, %cst [1] : vector<2x8x128xf32> to vector<2x128xf32>
    %cst_9 = arith.constant 8.000000e+00 : f32
    %12 = vector.broadcast %cst_9 : f32 to vector<2x128xf32>
    %13 = arith.divf %11, %12 : vector<2x128xf32>
    %c0_10 = arith.constant 0 : index
    %c0_11 = arith.constant 0 : index
    %14 = vector.load %arg4[%c0_10, %c0_11] : memref<128x128xf32, #tpu.memory_space<vmem>>, vector<128x128xf32>
    %cst_12 = arith.constant dense<0.000000e+00> : vector<2x128xf32>
    %15 = tpu.matmul %13, %14, %cst_12 {dimension_numbers = #tpu.dot_dimension_numbers<[1], [1], [0], [0], [0, 0, 1, 0], [], []>} : vector<2x128xf32>, vector<128x128xf32>, vector<2x128xf32> -> vector<2x128xf32>
    %c0_13 = arith.constant 0 : index
    %c0_14 = arith.constant 0 : index
    %16 = vector.load %arg5[%c0_13, %c0_14] : memref<1x128xf32, #tpu.memory_space<vmem>>, vector<1x128xf32>
    %17 = vector.broadcast %16 : vector<1x128xf32> to vector<2x128xf32>
    %18 = arith.addf %15, %17 : vector<2x128xf32>
    %c0_15 = arith.constant 0 : index
    %c0_16 = arith.constant 0 : index
    %19 = vector.load %arg6[%c0_15, %c0_16] : memref<2x128xf32, #tpu.memory_space<vmem>>, vector<2x128xf32>
    tpu.vector_store %arg6[%c0_15, %c0_16], %18 {strides = array<i32>} : memref<2x128xf32, #tpu.memory_space<vmem>>, vector<2x128xf32>,
    return
  }
}

</mosaic_0001>

<bundles_post_ra>
// kernel: tpu_custom_call.1
= control target key start
LH: loop header
LB: loop body
LE: loop exit
PB: predicated region body
PF: predicated region fallthrough
CT: control target
= control target key end

     0   :  { %11 = vsyncpa [#allocation3], 0  ;;  %s559_s0 = inlined_call_operand.hbm [shape: f32[2,8,128], index: 0, kind: input, shape index: {}]   ;;  %s560_s1 = inlined_call_operand.hbm [shape: f32[2,8,128], index: 1, kind: input, shape index: {}]   ;;  %s561_s2 = inlined_call_operand.hbm [shape: f32[8,128], index: 2, kind: input, shape index: {}]   ;;  %s562_s3 = inlined_call_operand.vmem [shape: f32[8,128], index: 3, kind: input, shape index: {}]   ;;  %s563_s4 = inlined_call_operand.hbm [shape: f32[128,128], index: 4, kind: input, shape index: {}]   ;;  %s564_s5 = inlined_call_operand.vmem [shape: f32[1,128], index: 5, kind: input, shape index: {}]   ;;  %s565_s6 = inlined_call_operand.hbm [shape: f32[2,128], index: 6, kind: output, shape index: {}]  }
   0x1   :  { %12 = vsyncpa [#allocation6], 0 }
   0x2   :  { %13 = vsyncpa [#allocation9], 0 }
   0x3   :  { %14 = vsyncpa [#allocation4], 0  ;;  %s425_s21 = smov [#allocation5]   ;;  %s426_s23 = smov [#allocation2]  }
   0x4   :  { %s32_s22 = sshll.u32 %s425_s21, 4  ;;  %s20_s24 = sshll.u32 %s426_s23, 4  ;;  %s33_s22 = int_to_ptr.vmem [resolvable:$true] %s32_s22  ;;  %s470_s24 = int_to_ptr.vmem [resolvable:$true] %s20_s24 }
   0x5   :  { %s307_s27 = scalar_lea.hbm %s560_s1, 256 }
   0x6   :  { %p308_p0 = scmp.ne.s32.totalorder %s560_s1, %s307_s27  ;;  %p311_p1 = scmp.lt.u32.totalorder %s307_s27, %s560_s1 }
   0x8   :  { %p313_p2 = pnand %p311_p1, %p308_p0 }
   0xa   :  { %316 = shalt.err (!%p313_p2)
}
   0xb   :  { %s317_s8 = scalar_lea.vmem %s33_s22, 256  ;;  %p322_p4 = scmp.lt.s32.totalorder %s33_s22, %s33_s22 }
   0xc   :  { %p318_p3 = scmp.ne.s32.totalorder %s33_s22, %s317_s8  ;;  %p323_p5 = scmp.lt.s32.totalorder %s317_s8, %s317_s8 }
   0xe   :  { %p324_p6 = por %p323_p5, %p322_p4 }
  0x10   :  { %p325_p7 = pnand %p324_p6, %p318_p3 }
  0x12   :  { %328 = shalt.err (!%p325_p7)
}
  0x13   :  { %s427_s9 = smov 128   ;;  %s428_s10 = smov 8  }
  0x14   :  { %38 = dma.hbm_to_vmem [thread:$0]  %s560_s1, 256, %s33_s22, [#allocation6], %s427_s9, %s427_s9, %s428_s10  }
  0x15   :  { %s329_s15 = scalar_lea.hbm %s559_s0, 256 }
  0x16   :  { %p330_p8 = scmp.ne.s32.totalorder %s559_s0, %s329_s15  ;;  %p333_p9 = scmp.lt.u32.totalorder %s329_s15, %s559_s0 }
  0x18   :  { %p335_p10 = pnand %p333_p9, %p330_p8 }
  0x1a   :  { %338 = shalt.err (!%p335_p10)
}
  0x1b   :  { %s339_s20 = scalar_lea.vmem %s470_s24, 256  ;;  %p344_p12 = scmp.lt.s32.totalorder %s470_s24, %s470_s24 }
  0x1c   :  { %p340_p11 = scmp.ne.s32.totalorder %s470_s24, %s339_s20  ;;  %p345_p13 = scmp.lt.s32.totalorder %s339_s20, %s339_s20 }
  0x1e   :  { %p346_p0 = por %p345_p13, %p344_p12 }
  0x20   :  { %p347_p1 = pnand %p346_p0, %p340_p11 }
  0x22   :  { %350 = shalt.err (!%p347_p1)
}
  0x23   :  { %26 = dma.hbm_to_vmem [thread:$0]  %s559_s0, 256, %s470_s24, [#allocation3], %s427_s9, %s427_s9, %s428_s10  }
  0x24   :  { %s429_s22 = smov [#allocation7]   ;;  %s430_s25 = smov [#allocation8]  }
  0x25   :  { %s45_s23 = sshll.u32 %s429_s22, 4  ;;  %s56_s26 = sshll.u32 %s430_s25, 4  ;;  %s46_s23 = int_to_ptr.vmem [resolvable:$true] %s45_s23  ;;  %s507_s26 = int_to_ptr.vmem [resolvable:$true] %s56_s26 }
  0x26   :  { %s351_s29 = scalar_lea.hbm %s561_s2, 128 }
  0x27   :  { %p352_p2 = scmp.ne.s32.totalorder %s561_s2, %s351_s29  ;;  %p355_p3 = scmp.lt.u32.totalorder %s351_s29, %s561_s2 }
  0x29   :  { %p357_p4 = pnand %p355_p3, %p352_p2 }
  0x2b   :  { %360 = shalt.err (!%p357_p4)
}
  0x2c   :  { %s361_s0 = scalar_lea.vmem %s46_s23, 128  ;;  %p366_p6 = scmp.lt.s32.totalorder %s46_s23, %s46_s23 }
  0x2d   :  { %p362_p5 = scmp.ne.s32.totalorder %s46_s23, %s361_s0  ;;  %p367_p7 = scmp.lt.s32.totalorder %s361_s0, %s361_s0 }
  0x2f   :  { %p368_p8 = por %p367_p7, %p366_p6 }
  0x31   :  { %p369_p9 = pnand %p368_p8, %p362_p5 }
  0x33   :  { %372 = shalt.err (!%p369_p9)
}
  0x34   :  { %48 = dma.hbm_to_vmem [thread:$0]  %s561_s2, 128, %s46_s23, [#allocation6]  }
  0x35   :  { %s373_s15 = scalar_lea.hbm %s563_s4, 2048 }
  0x36   :  { %p374_p10 = scmp.ne.s32.totalorder %s563_s4, %s373_s15  ;;  %p377_p11 = scmp.lt.u32.totalorder %s373_s15, %s563_s4 }
  0x38   :  { %p379_p12 = pnand %p377_p11, %p374_p10 }
  0x3a   :  { %382 = shalt.err (!%p379_p12)
}
  0x3b   :  { %s383_s20 = scalar_lea.vmem %s507_s26, 2048  ;;  %p388_p0 = scmp.lt.s32.totalorder %s507_s26, %s507_s26 }
  0x3c   :  { %p384_p13 = scmp.ne.s32.totalorder %s507_s26, %s383_s20  ;;  %p389_p1 = scmp.lt.s32.totalorder %s383_s20, %s383_s20 }
  0x3e   :  { %p390_p2 = por %p389_p1, %p388_p0 }
  0x40   :  { %p391_p3 = pnand %p390_p2, %p384_p13 }
  0x42   :  { %394 = shalt.err (!%p391_p3)
}
  0x43   :  { %62 = dma.hbm_to_vmem [thread:$0]  %s563_s4, 2048, %s507_s26, [#allocation9], %s427_s9, %s427_s9, %s428_s10  }
  0x44   :  { %417 = dma.done.wait [#allocation3], 256  }
  0x45   :  { %418 = vsyncadd [#allocation3], 4294967040 }
  0x46   :  { %419 = dma.done.wait [#allocation6], 384  }
  0x47   :  { %420 = vsyncadd [#allocation6], 4294966912 }
  0x48   :  { %421 = dma.done.wait [#allocation9], 2048  }
  0x49   :  { %422 = vsyncadd [#allocation9], 4294965248  ;;  %v431_v0 = vmov 0.0|0.0   ;;  %vm432_vm0 = vmmov 0   ;;  %v433_v1 = vmov 0.0   ;;  %v104_v2 = vld [vmem:[#allocation8] sm:$0xff] }
  0x4a   :  { %273 = vmatprep.subr.bf16.mxu0 %v431_v0  ;;  %270 = vmatprep.mubr.msk.f32.mxu0 %vm432_vm0, %v433_v1  ;;  %v105_v3 = vld [vmem:[#allocation8 + $0x8] sm:$0xff]  ;;  %v106_v5 = vld [vmem:[#allocation8 + $0x10] sm:$0xff]  ;;  %v107_v6 = vld [vmem:[#allocation8 + $0x18] sm:$0xff]  ;;  %vm129_vm1 = vcmask 1041409   ;;  %s434_s21 = smov [#allocation10]  }
  0x4b   :  { %v274_v4 = vpack.c.bf16 %v105_v3, %v104_v2  ;;  %v277_v7 = vpack.c.bf16 %v107_v6, %v106_v5  ;;  %v108_v8 = vld [vmem:[#allocation8 + $0x20] sm:$0xff]  ;;  %v109_v9 = vld [vmem:[#allocation8 + $0x28] sm:$0xff]  ;;  %v110_v11 = vld [vmem:[#allocation8 + $0x30] sm:$0xff]  ;;  %s209_s22 = sshll.u32 %s434_s21, 4  ;;  %s210_s22 = int_to_ptr.vmem [resolvable:$true] %s209_s22 }
  0x4c   :  { %v280_v10 = vpack.c.bf16 %v109_v9, %v108_v8  ;;  %v111_v12 = vld [vmem:[#allocation8 + $0x38] sm:$0xff]  ;;  %v78_v15 = vld [vmem:[#allocation2 + $0x8] sm:$0xff]  ;;  %v82_v17 = vld [vmem:[#allocation5] sm:$0xff]  ;;  %s395_s23 = scalar_lea.vmem %s210_s22, 32  ;;  %p400_p5 = scmp.lt.s32.totalorder %s210_s22, %s210_s22 }
  0x4d   :  { %275 = vmatpush3.bf16.xpose.msra.mxu0 %v274_v4  ;;  %v283_v13 = vpack.c.bf16 %v111_v12, %v110_v11  ;;  %v77_v14 = vld [vmem:[#allocation2] sm:$0xff]  ;;  %v83_v18 = vld [vmem:[#allocation5 + $0x8] sm:$0xff]  ;;  %v112_v24 = vld [vmem:[#allocation8 + $0x40] sm:$0xff]  ;;  %p396_p4 = scmp.ne.s32.totalorder %s210_s22, %s395_s23  ;;  %p401_p6 = scmp.lt.s32.totalorder %s395_s23, %s395_s23 }
  0x4e   :  { %276 = vmatprep.subr.bf16.mxu0 %v431_v0  ;;  %v79_v16 = vld [vmem:[#allocation7] sm:$0xff]  ;;  %v113_v25 = vld [vmem:[#allocation8 + $0x48] sm:$0xff]  ;;  %v114_v31 = vld [vmem:[#allocation8 + $0x50] sm:$0xff] }
  0x4f   :  { %v84_v19 = vld [vmem:[%s562_s3] sm:$0xff]  ;;  %v80_v20 = vmul.f32 %v79_v16, %v77_v14  ;;  %v81_v21 = vmul.f32 %v79_v16, %v78_v15  ;;  %v286_v26 = vpack.c.bf16 %v113_v25, %v112_v24  ;;  %v116_v38 = vld [vmem:[#allocation8 + $0x60] sm:$0xff]  ;;  %v117_v39 = vld [vmem:[#allocation8 + $0x68] sm:$0xff]  ;;  %p402_p7 = por %p401_p6, %p400_p5 }
  0x50   :  { %v85_v22 = vmul.f32 %v84_v19, %v82_v17  ;;  %v86_v23 = vmul.f32 %v84_v19, %v83_v18  ;;  %v115_v32 = vld [vmem:[#allocation8 + $0x58] sm:$0xff]  ;;  %v292_v40 = vpack.c.bf16 %v117_v39, %v116_v38  ;;  %v118_v45 = vld [vmem:[#allocation8 + $0x70] sm:$0xff] }
  0x51   :  { %v289_v33 = vpack.c.bf16 %v115_v32, %v114_v31  ;;  %v119_v46 = vld [vmem:[#allocation8 + $0x78] sm:$0xff]  ;;  %p403_p8 = pnand %p402_p7, %p396_p4 }
  0x52   :  { %v87_v27 = vsub.f32 %v80_v20, %v85_v22  ;;  %v88_v28 = vsub.f32 %v81_v21, %v86_v23  ;;  %v295_v47 = vpack.c.bf16 %v119_v46, %v118_v45  ;;  %v220_v53 = vld [vmem:[%s564_s5] ss:$0 sm:$0xff] }
  0x54   :  { %v89_v29 = vrot.slane %v87_v27, 4  ;;  %v95_v30 = vrot.slane %v88_v28, 4 }
  0x55   :  { %278 = vmatpush3.bf16.xpose.msra.mxu0 %v277_v7 }
  0x56   :  { %279 = vmatprep.subr.bf16.mxu0 %v431_v0  ;;  %v90_v34 = vadd.f32 %v89_v29, %v87_v27  ;;  %v96_v35 = vadd.f32 %v95_v30, %v88_v28 }
  0x58   :  { %v91_v36 = vrot.slane %v90_v34, 2  ;;  %v97_v37 = vrot.slane %v96_v35, 2 }
  0x5a   :  { %v92_v41 = vadd.f32 %v91_v36, %v90_v34  ;;  %v98_v42 = vadd.f32 %v97_v37, %v96_v35 }
  0x5c   :  { %v93_v43 = vrot.slane %v92_v41, 1  ;;  %v99_v44 = vrot.slane %v98_v42, 1 }
  0x5d   :  { %281 = vmatpush3.bf16.xpose.msra.mxu0 %v280_v10 }
  0x5e   :  { %282 = vmatprep.subr.bf16.mxu0 %v431_v0  ;;  %v94_v48 = vadd.f32 %v93_v43, %v92_v41  ;;  %v100_v49 = vadd.f32 %v99_v44, %v98_v42 }
  0x60   :  { %v102_v50 = vmul.f32 0.125, %v94_v48  ;;  %v103_v51 = vmul.f32 0.125, %v100_v49 }
  0x62   :  { %v130_v52 = vsel %vm129_vm1, %v103_v51, %v102_v50 }
  0x65   :  { %284 = vmatpush3.bf16.xpose.msra.mxu0 %v283_v13 }
  0x66   :  { %285 = vmatprep.subr.bf16.mxu0 %v431_v0 }
  0x6d   :  { %287 = vmatpush3.bf16.xpose.msra.mxu0 %v286_v26 }
  0x6e   :  { %288 = vmatprep.subr.bf16.mxu0 %v431_v0 }
  0x75   :  { %290 = vmatpush3.bf16.xpose.msra.mxu0 %v289_v33 }
  0x76   :  { %291 = vmatprep.subr.bf16.mxu0 %v431_v0 }
  0x7d   :  { %293 = vmatpush3.bf16.xpose.msra.mxu0 %v292_v40 }
  0x7e   :  { %294 = vmatprep.subr.bf16.mxu0 %v431_v0 }
  0x85   :  { %296 = vmatpush3.bf16.xpose.msra.mxu0 %v295_v47 }
  0x8c   :  { %271 = vmatmul.mubr.f32.vlgmr.msra.gmra.mrb[0].mxu0 %v130_v52 }
 0x15f   :  { %v198_v54 = vpop.f32.mrb[0].mxu0 }
 0x160   :  { %v199_v55 = vadd.f32 %v220_v53, %v198_v54  ;;  %v272_v56 = vpop.f32.mrb[1].mxu0 }
 0x162   :  { %202 = vst [vmem:[#allocation10] sm:$0x3] %v199_v55 }
 0x163   :  { %406 = shalt.err (!%p403_p8)
}
 0x164   :  { %s407_s27 = scalar_lea.hbm %s565_s6, 32 }
 0x165   :  { %p408_p9 = scmp.ne.s32.totalorder %s565_s6, %s407_s27  ;;  %p411_p10 = scmp.lt.u32.totalorder %s407_s27, %s565_s6 }
 0x167   :  { %p413_p11 = pnand %p411_p10, %p408_p9 }
 0x169   :  { %416 = shalt.err (!%p413_p11)
}
 0x16a   :  { %212 = dma.vmem_to_hbm [thread:$0]  %s210_s22, 32, %s565_s6, [#allocation4]  }
 0x16b   :  { %423 = dma.done.wait [#allocation4], 32  }
 0x16c   :  { %424 = vsyncadd [#allocation4], 4294967264 }
 0x16d   :  { %216 = vsyncpa [#allocation3], 1 }
 0x16e   :  { %217 = vsyncpa [#allocation6], 1 }
 0x16f   :  { %218 = vsyncpa [#allocation9], 1 }
 0x170   :  { %219 = vsyncpa [#allocation4], 1 }

</bundles_post_ra>
